<compile_context>
chip_gen: v7x
topology: tpu7x:2x2x1
jax: 0.10.0
libtpu: 0.0.40
codegen_flags: <defaults>
</compile_context>

<pallas_src>
import numpy as np
import jax
import jax.numpy as jnp
from jax.experimental import pallas as pl
from jax.experimental.pallas import tpu as pltpu


def _round_up(x, m):
    return ((x + m - 1) // m) * m


def _choose_m_tiling(m, tm_target=2048):
    """Pick (TM, m_pad): lane-tile width and padded M, both multiples of 128.

    Prefers a tile that divides the 128-padded M exactly (zero extra lane
    padding); only pads M further when the divisor-based tile would be tiny
    (< 512) and the extra padding stays <= ~12.5%.
    """
    m128 = _round_up(m, 128)
    if m128 <= tm_target:
        return m128, m128                       # single lane tile per image
    tm = 128
    for cand in range(tm_target, 127, -128):
        if m128 % cand == 0:
            tm = cand
            break
    if tm < 512:
        m_big = _round_up(m, tm_target)
        if m_big - m128 <= max(m128 // 8, 128):
            return tm_target, m_big
    return tm, m128


# ---------------------------------------------------------------------------
# Deterministic Gabor weight construction (GFB.__init__ + GFB.initialize,
# complex_color2=False branch).  Synthetic parameters, no checkpoint loading.
# ---------------------------------------------------------------------------
def gabor_kernel(frequency, sigma_x, sigma_y, theta=0.0, offset=0.0, ks=7):
    """Real-valued Gabor kernel (numpy), fully deterministic."""
    w = ks // 2
    grid = np.arange(-w, w + 1, dtype=np.float64)[:ks]
    y, x = np.meshgrid(grid, grid, indexing="ij")
    rotx = x * np.cos(theta) + y * np.sin(theta)
    roty = -x * np.sin(theta) + y * np.cos(theta)
    g = np.exp(-0.5 * (rotx ** 2 / sigma_x ** 2 + roty ** 2 / sigma_y ** 2))
    g /= 2.0 * np.pi * sigma_x * sigma_y
    g *= np.cos(2.0 * np.pi * frequency * rotx + offset)
    return g.astype(np.float32)


def make_gfb_weight(in_channels, out_channels, kernel_size, seed=0):
    """One Gabor filter per output channel, placed on input channel color[i]."""
    rng = np.random.RandomState(seed)
    sf = rng.uniform(0.05, 0.25, size=out_channels)
    theta = rng.uniform(0.0, np.pi, size=out_channels)
    sigx = rng.uniform(1.0, 3.0, size=out_channels)
    sigy = rng.uniform(1.0, 3.0, size=out_channels)
    phase = rng.uniform(0.0, 2.0 * np.pi, size=out_channels)
    color = rng.randint(0, in_channels, size=out_channels)

    weight = np.zeros((out_channels, in_channels, kernel_size, kernel_size),
                      dtype=np.float32)
    for i in range(out_channels):
        weight[i, int(color[i])] = gabor_kernel(
            frequency=sf[i], sigma_x=sigx[i], sigma_y=sigy[i],
            theta=theta[i], offset=phase[i], ks=kernel_size)
    return jnp.asarray(weight)


# ---------------------------------------------------------------------------
# Pallas kernel: one (C_out_pad, K_pad) x (K_pad, TM) MXU matmul per grid
# step.  The weight block is grid-invariant (resident in VMEM); M (lane dim)
# tiles are disjoint per step, so both grid axes are "parallel".
# ---------------------------------------------------------------------------
def _gfb_matmul_kernel(w_ref, a_ref, o_ref):
    o_ref[0] = jnp.dot(w_ref[...], a_ref[0],
                       preferred_element_type=jnp.float32)


def gfb_forward(x, weight, stride):
    """F.conv2d(x, weight, None, stride, k//2) with x NCHW, weight OIHW."""
    n, c_in, h, w = x.shape
    c_out, _, kh, kw = weight.shape
    ph, pw = kh // 2, kw // 2
    h_out = (h + 2 * ph - kh) // stride + 1
    w_out = (w + 2 * pw - kw) // stride + 1
    m_img = h_out * w_out
    k_dim = c_in * kh * kw

    x_pad = jnp.pad(x, ((0, 0), (0, 0), (ph, ph), (pw, pw)))

    # im2col (plain-JAX glue), built per image directly in (N, K, M) layout:
    #   K = C_in * kh * kw   (c-major, then kh, kw -- matches weight.reshape)
    #   M = H_out * W_out    (oh-major, ow-minor)
    # TODO(synk): fuse this into the kernel's input DMA to remove one HBM
    # round trip of the patch matrix (the biggest remaining cost).
    taps = []
    for i in range(kh):
        for j in range(kw):
            taps.append(jax.lax.slice(
                x_pad,
                (0, 0, i, j),
                (n, c_in,
                 i + (h_out - 1) * stride + 1,
                 j + (w_out - 1) * stride + 1),
                (1, 1, stride, stride)))              # (N, C_in, Ho, Wo)
    patches = jnp.stack(taps, axis=2)                 # (N, C_in, kh*kw, Ho, Wo)
    patches = patches.reshape(n, k_dim, m_img)        # (N, K, M)

    w_flat = weight.reshape(c_out, k_dim)             # (C_out, K)

    # --- TPU-friendly padding (zero padding does not change the result) ----
    k_pad = _round_up(k_dim, 16)       # bf16 sublane multiple; K never tiled
    c_out_pad = _round_up(c_out, 16)   # sublane dim of the small operand
    tm, m_pad = _choose_m_tiling(m_img)

    a = jnp.pad(patches.astype(jnp.bfloat16),
                ((0, 0), (0, k_pad - k_dim), (0, m_pad - m_img)))
    w_p = jnp.pad(w_flat.astype(jnp.bfloat16),
                  ((0, c_out_pad - c_out), (0, k_pad - k_dim)))

    cost = pl.CostEstimate(
        flops=2 * n * m_img * k_dim * c_out,
        transcendentals=0,
        bytes_accessed=(n * k_pad * m_pad * 2          # A (bf16)
                        + c_out_pad * k_pad * 2        # W (bf16)
                        + n * c_out_pad * m_pad * 4))  # out (f32)

    out = pl.pallas_call(
        _gfb_matmul_kernel,
        out_shape=jax.ShapeDtypeStruct((n, c_out_pad, m_pad), jnp.float32),
        grid_spec=pltpu.PrefetchScalarGridSpec(
            num_scalar_prefetch=0,
            grid=(n, m_pad // tm),
            in_specs=[
                # Grid-invariant weight block -> stays resident in VMEM.
                pl.BlockSpec((c_out_pad, k_pad), lambda bi, mi: (0, 0)),
                # One TM-wide slab of patch columns of image `bi` per step.
                pl.BlockSpec((1, k_pad, tm), lambda bi, mi: (bi, 0, mi)),
            ],
            out_specs=pl.BlockSpec((1, c_out_pad, tm),
                                   lambda bi, mi: (bi, 0, mi)),
        ),
        compiler_params=pltpu.CompilerParams(
            dimension_semantics=("parallel", "parallel")),
        cost_estimate=cost,
    )(w_p, a)

    # Un-pad; already in (N, C_out, Ho, Wo) order -> no host-side transpose.
    return out[:, :c_out, :m_img].reshape(n, c_out, h_out, w_out)


if __name__ == "__main__":
    key = jax.random.PRNGKey(0)
    N, C_IN, H, W = 2, 3, 16, 16
    C_OUT, KSIZE, STRIDE = 16, 7, 4

    x = jax.random.normal(key, (N, C_IN, H, W), dtype=jnp.float32)
    weight = make_gfb_weight(C_IN, C_OUT, KSIZE, seed=0)

    gfb = jax.jit(gfb_forward, static_argnames=("stride",))
    y = jax.block_until_ready(gfb(x, weight, stride=STRIDE))

    # Shape + numerical sanity check against XLA's conv (f32 reference; the
    # kernel uses bf16 operands with f32 accumulation -> not bit-identical).
    h_out = (H + 2 * (KSIZE // 2) - KSIZE) // STRIDE + 1
    w_out = (W + 2 * (KSIZE // 2) - KSIZE) // STRIDE + 1
    assert y.shape == (N, C_OUT, h_out, w_out), y.shape
    y_ref = jax.lax.conv_general_dilated(
        x, weight, window_strides=(STRIDE, STRIDE),
        padding=[(KSIZE // 2, KSIZE // 2)] * 2,
        dimension_numbers=("NCHW", "OIHW", "NCHW"))
    np.testing.assert_allclose(np.asarray(y), np.asarray(y_ref),
                               rtol=2e-2, atol=2e-2)
    print("KERNEL_OK")
</pallas_src>

<mosaic_0001>
module attributes {stable_mosaic.version = 11 : i64} {
  func.func @_gfb_matmul_kernel(%arg0: i32, %arg1: i32, %arg2: memref<16x160xbf16, #tpu.memory_space<vmem>>, %arg3: memref<1x160x128xbf16, #tpu.memory_space<vmem>>, %arg4: memref<1x16x128xf32, #tpu.memory_space<vmem>>) attributes {dimension_semantics = [#tpu.dimension_semantics<parallel>, #tpu.dimension_semantics<parallel>], iteration_bounds = array<i64: 2, 1>, scalar_prefetch = 0 : i64, scratch_operands = 0 : i64, tpu.core_type = #tpu.core_type<tc>, window_params = [{pipeline_mode = #tpu.pipeline_mode<synchronous>, transform_indices = @transform_0, window_bounds = array<i64: 16, 160>}, {transform_indices = @transform_1, window_bounds = array<i64: 1, 160, 128>}, {transform_indices = @transform_2, window_bounds = array<i64: 1, 16, 128>}]} {
    %c0 = arith.constant 0 : index
    %c0_0 = arith.constant 0 : index
    %0 = vector.load %arg2[%c0, %c0_0] : memref<16x160xbf16, #tpu.memory_space<vmem>>, vector<16x160xbf16>
    %c0_1 = arith.constant 0 : index
    %c0_2 = arith.constant 0 : index
    %c0_3 = arith.constant 0 : index
    %1 = vector.load %arg3[%c0_1, %c0_2, %c0_3] : memref<1x160x128xbf16, #tpu.memory_space<vmem>>, vector<1x160x128xbf16>
    %2 = vector.shape_cast %1 : vector<1x160x128xbf16> to vector<160x128xbf16>
    %cst = arith.constant dense<0.000000e+00> : vector<16x128xf32>
    %3 = tpu.matmul %0, %2, %cst {dimension_numbers = #tpu.dot_dimension_numbers<[1], [0], [0], [1], [0, 0, 1, 1], [], []>} : vector<16x160xbf16>, vector<160x128xbf16>, vector<16x128xf32> -> vector<16x128xf32>
    %c0_4 = arith.constant 0 : index
    %c0_5 = arith.constant 0 : index
    %c0_6 = arith.constant 0 : index
    %4 = vector.load %arg4[%c0_4, %c0_5, %c0_6] : memref<1x16x128xf32, #tpu.memory_space<vmem>>, vector<1x16x128xf32>
    %5 = vector.shape_cast %4 : vector<1x16x128xf32> to vector<16x128xf32>
    %6 = vector.shape_cast %3 : vector<16x128xf32> to vector<1x16x128xf32>
    tpu.vector_store %arg4[%c0_4, %c0_5, %c0_6], %6 {strides = array<i32>} : memref<1x16x128xf32, #tpu.memory_space<vmem>>, vector<1x16x128xf32>,
    return
  }
  func.func @transform_0(%arg0: i32, %arg1: i32) -> (i32, i32) {
    %c0_i32 = arith.constant 0 : i32
    %c0_i32_0 = arith.constant 0 : i32
    %c0_i32_1 = arith.constant 0 : i32
    return %c0_i32, %c0_i32_0 : i32, i32
  }
  func.func @transform_1(%arg0: i32, %arg1: i32) -> (i32, i32, i32) {
    %c0_i32 = arith.constant 0 : i32
    %c0_i32_0 = arith.constant 0 : i32
    return %arg0, %c0_i32, %arg1 : i32, i32, i32
  }
  func.func @transform_2(%arg0: i32, %arg1: i32) -> (i32, i32, i32) {
    %c0_i32 = arith.constant 0 : i32
    %c0_i32_0 = arith.constant 0 : i32
    return %arg0, %c0_i32, %arg1 : i32, i32, i32
  }
}

</mosaic_0001>

<bundles_post_ra>
// kernel: gfb_forward.1
= control target key start
LH: loop header
LB: loop body
LE: loop exit
PB: predicated region body
PF: predicated region fallthrough
CT: control target
= control target key end

     0   :  { %s500_s9 = smov 0   ;;  %s502_s10 = smov 0   ;;  %s543_s0 = inlined_call_operand.vmem [shape: bf16[16,160], index: 0, kind: input, shape index: {}]   ;;  %s544_s1 = inlined_call_operand.vmem [shape: bf16[2,160,128], index: 1, kind: input, shape index: {}]   ;;  %s545_s2 = inlined_call_operand.vmem [shape: f32[2,16,128], index: 2, kind: output, shape index: {}]  }
   0x1   :  { %s504_s11 = smov 0  }
   0x2 LB: > { %s24_s12 = sadd.s32 1, %s478_s10  ;;  %p401_p0 = scmp.ge.s32.totalorder %s482_s11, 1  ;;  %s482_s11 = sphi %s504_s11, %s12_s11   ;;  %s478_s10 = sphi %s502_s10, %s547_s10   ;;  %s474_s9 = sphi %s500_s9, %s546_s9  }
   0x3   : > { %p26_p1 = scmp.ge.s32.totalorder %s24_s12, 2  ;;  %p131_p2 = scmp.lt.s32.totalorder %s482_s11, 3 }
   0x5   : > { %s549_s12 = smov (%p26_p1, %s24_s12), 0  ;;  %p132_p3 = pnand %p401_p0, %p131_p2 }
   0x6   : > { %p159_p4 = scmp.lt.s32.totalorder (!%p132_p3), %s474_s9, 1  ;;  %v484_v0 = vmov (!%p132_p3), 0   ;;  %v459_v1 = vld [vmem:[%s543_s0 + $0x4] ss:$8 sps:$4 sm:$0xff] (!%p132_p3)   ;;  %vm267_vm0 = vcmask (!%p132_p3), 261120  }
   0x7   : > { %135 = sbr.rel (%p132_p3) target bundleno = 273 (0x111), region = 28  ;;  %271 = vmatprep.subr.bf16.mxu0 (!%p132_p3), %v484_v0  ;;  %417 = vmatprep.mubr.msk.bf16.mxu0 (!%p132_p3), %vm267_vm0, %v459_v1  ;;  %v457_v12 = vld [vmem:[%s543_s0] ss:$8 sps:$4 sm:$0xff] (!%p132_p3)  }
   0xe   : > { %s551_s9 = smov (!%p159_p4, %s474_s9), 1 }
   0xf   : > { %s421_s15 = smul.u32 80, %s551_s9  ;;  %s420_s21 = sshll.u32 %s551_s9, 4 }
  0x10   : > { %s174_s24 = scalar_lea.vmem %s545_s2, %s420_s21 }
  0x11   : > { %s166_s18 = scalar_lea.vmem %s544_s1, %s421_s15 }
  0x12   : > { %v447_v2 = vld [vmem:[%s166_s18] sm:$0xff]   ;;  %v448_v3 = vld [vmem:[%s166_s18 + $0x8] sm:$0xff]   ;;  %v449_v4 = vld [vmem:[%s166_s18 + $0x10] sm:$0xff]  }
  0x13   : > { %272 = vmatpush1.bf16.msra.mxu0 %v447_v2  ;;  %v450_v5 = vld [vmem:[%s166_s18 + $0x18] sm:$0xff]   ;;  %v451_v6 = vld [vmem:[%s166_s18 + $0x20] sm:$0xff]   ;;  %v452_v7 = vld [vmem:[%s166_s18 + $0x28] sm:$0xff]  }
  0x14   : > { %273 = vmatprep.subr.bf16.mxu0 %v484_v0  ;;  %v453_v8 = vld [vmem:[%s166_s18 + $0x30] sm:$0xff]   ;;  %v454_v9 = vld [vmem:[%s166_s18 + $0x38] sm:$0xff]   ;;  %v455_v10 = vld [vmem:[%s166_s18 + $0x40] sm:$0xff]  }
  0x15   : > { %v456_v11 = vld [vmem:[%s166_s18 + $0x48] sm:$0xff]  }
  0x17   : > { %274 = vmatpush1.bf16.msra.mxu0 %v448_v3 }
  0x18   : > { %275 = vmatprep.subr.bf16.mxu0 %v484_v0 }
  0x1b   : > { %276 = vmatpush1.bf16.msra.mxu0 %v449_v4 }
  0x1c   : > { %277 = vmatprep.subr.bf16.mxu0 %v484_v0 }
  0x1f   : > { %278 = vmatpush1.bf16.msra.mxu0 %v450_v5 }
  0x20   : > { %279 = vmatprep.subr.bf16.mxu0 %v484_v0 }
  0x23   : > { %280 = vmatpush1.bf16.msra.mxu0 %v451_v6 }
  0x24   : > { %281 = vmatprep.subr.bf16.mxu0 %v484_v0 }
  0x27   : > { %282 = vmatpush1.bf16.msra.mxu0 %v452_v7 }
  0x28   : > { %283 = vmatprep.subr.bf16.mxu0 %v484_v0 }
  0x2b   : > { %284 = vmatpush1.bf16.msra.mxu0 %v453_v8 }
  0x2c   : > { %285 = vmatprep.subr.bf16.mxu0 %v484_v0 }
  0x2f   : > { %286 = vmatpush1.bf16.msra.mxu0 %v454_v9 }
  0x30   : > { %287 = vmatprep.subr.bf16.mxu0 %v484_v0 }
  0x33   : > { %288 = vmatpush1.bf16.msra.mxu0 %v455_v10 }
  0x34   : > { %289 = vmatprep.subr.bf16.mxu0 %v484_v0 }
  0x37   : > { %290 = vmatpush1.bf16.msra.mxu0 %v456_v11 }
  0x3a   : > { %304 = vmatmul.mubr.bf16.vlgmr.msra.gmra.mrb[0].mxu0 %v457_v12 }
 0x10d   : > { %v305_v13 = vpop.f32.mrb[0].mxu0 }
 0x10e   : > { %312 = vst [vmem:[%s174_s24] sm:$0xff] %v305_v13  ;;  %v307_v14 = vpop.f32.mrb[1].mxu0 }
 0x10f   : > { %v308_v15 = vpop.f32.mrb[2].mxu0 }
 0x110   : > { %313 = vst [vmem:[%s174_s24 + $0x8] sm:$0xff] %v308_v15  ;;  %v310_v16 = vpop.f32.mrb[3].mxu0 }
 0x111 PF: > { %s12_s11 = sadd.s32 1, %s482_s11   ;;  %s546_s9 = smov %s478_s10 }
 0x112   : > { %p9_p5 = scmp.ge.s32.totalorder %s12_s11, 4   ;;  %s547_s10 = smov %s549_s12 }
 0x114   :  { %11 = sbr.rel (!%p9_p5) target bundleno = 2 (0x2), region = 58 }

</bundles_post_ra>
